<compile_context>
chip_gen: v5e
topology: v5e:2x2
jax: 0.10.0
libtpu: 0.0.40
codegen_flags: <defaults>
</compile_context>

<pallas_src>
import functools

import jax
import jax.numpy as jnp
from jax.experimental import pallas as pl
from jax.experimental.pallas import tpu as pltpu

LANE = 128
MiB = 1024 * 1024


def _round_up(x, m):
    return (x + m - 1) // m * m


def _largest_divisor_tile(total, candidates=(512, 256, 128)):
    for c in candidates:
        if total % c == 0:
            return c
    return 128


# ---------------------------------------------------------------------------
# Shared epilogue (runs on the f32 accumulator)
# ---------------------------------------------------------------------------
def _apply_epilogue(h, epilogue, num_valid_cols):
    if epilogue == "relu":
        return jnp.maximum(h, 0.0)
    if epilogue == "log_softmax":
        # Row-wise log_softmax over the first `num_valid_cols` lanes only;
        # padded class columns are masked out of max / sum.
        col = jax.lax.broadcasted_iota(jnp.int32, h.shape, 1)
        valid = col < num_valid_cols
        hm = jnp.where(valid, h, -1e30)
        m = jnp.max(hm, axis=1, keepdims=True)
        s = hm - m
        e = jnp.where(valid, jnp.exp(s), 0.0)
        lse = jnp.log(jnp.sum(e, axis=1, keepdims=True))
        return s - lse
    return h


# ---------------------------------------------------------------------------
# Pallas kernels
# ---------------------------------------------------------------------------
def xw_kernel(x_ref, w_ref, o_ref):
    """Per-layer feature transform: XW = X @ W (bf16 in, f32 acc, bf16 out)."""
    o_ref[...] = jnp.dot(
        x_ref[...], w_ref[...], preferred_element_type=jnp.float32
    ).astype(o_ref.dtype)


def a_matmul_kernel(a_ref, xw_ref, b_ref, o_ref, acc_ref, *,
                    epilogue, num_valid_cols, tk, xw_resident):
    """Tiled A_hat @ XW with fused bias + (ReLU | masked log_softmax) epilogue."""
    k = pl.program_id(1)

    @pl.when(k == 0)
    def _():
        acc_ref[...] = jnp.zeros_like(acc_ref)

    if xw_resident:
        # XW is fully VMEM-resident (constant index_map); slice current K chunk.
        start = pl.multiple_of(k * tk, LANE)
        xw = xw_ref[pl.ds(start, tk), :]
    else:
        xw = xw_ref[...]

    acc_ref[...] += jnp.dot(a_ref[...], xw, preferred_element_type=jnp.float32)

    @pl.when(k == pl.num_programs(1) - 1)
    def _():
        h = acc_ref[...] + b_ref[...].astype(jnp.float32)
        h = _apply_epilogue(h, epilogue, num_valid_cols)
        o_ref[...] = h.astype(o_ref.dtype)


def fused_layer_kernel(a_ref, x_ref, w_ref, b_ref, o_ref, *,
                       epilogue, num_valid_cols):
    """Single-tile layer for tiny graphs: (X@W) -> A@XW -> bias -> epilogue."""
    xw = jnp.dot(x_ref[...], w_ref[...], preferred_element_type=jnp.float32)
    h = jnp.dot(a_ref[...], xw.astype(jnp.bfloat16),
                preferred_element_type=jnp.float32)
    h = h + b_ref[...].astype(jnp.float32)
    h = _apply_epilogue(h, epilogue, num_valid_cols)
    o_ref[...] = h.astype(o_ref.dtype)


# ---------------------------------------------------------------------------
# Pallas wrappers
# ---------------------------------------------------------------------------
def matmul_xw(x_pad, w_pad):
    """XW = X @ W, row-tiled over the node dimension (small vs. the A matmul)."""
    n_pad, f_in_pad = x_pad.shape
    f_out_pad = w_pad.shape[1]
    tm = _largest_divisor_tile(n_pad)
    return pl.pallas_call(
        xw_kernel,
        out_shape=jax.ShapeDtypeStruct((n_pad, f_out_pad), jnp.bfloat16),
        grid_spec=pltpu.PrefetchScalarGridSpec(
            num_scalar_prefetch=0,
            grid=(n_pad // tm,),
            in_specs=[
                pl.BlockSpec((tm, f_in_pad), lambda i: (i, 0)),
                pl.BlockSpec((f_in_pad, f_out_pad), lambda i: (0, 0)),
            ],
            out_specs=pl.BlockSpec((tm, f_out_pad), lambda i: (i, 0)),
        ),
        compiler_params=pltpu.CompilerParams(dimension_semantics=("parallel",)),
    )(x_pad, w_pad)


def a_matmul(a_pad, xw_pad, b_pad, tm, tk, epilogue, num_valid_cols, out_dtype):
    """out = A_hat @ XW + b with fused epilogue; grid = (row tiles, K tiles)."""
    n_rows_pad, n_cols_pad = a_pad.shape
    f_out_pad = xw_pad.shape[1]

    # XW stays VMEM-resident across the whole grid if small enough.
    xw_bytes = n_cols_pad * f_out_pad * 2
    xw_resident = xw_bytes <= 8 * MiB
    if xw_resident:
        xw_spec = pl.BlockSpec((n_cols_pad, f_out_pad), lambda i, k: (0, 0))
    else:
        xw_spec = pl.BlockSpec((tk, f_out_pad), lambda i, k: (k, 0))

    kernel = functools.partial(
        a_matmul_kernel, epilogue=epilogue, num_valid_cols=num_valid_cols,
        tk=tk, xw_resident=xw_resident)

    out_itemsize = jnp.dtype(out_dtype).itemsize
    # VMEM estimate: double-buffered A tile + XW (resident or double-buffered
    # tile) + f32 acc + double-buffered output + bias + slack.
    need = (2 * tm * tk * 2
            + (xw_bytes if xw_resident else 2 * tk * f_out_pad * 2)
            + tm * f_out_pad * 4
            + 2 * tm * f_out_pad * out_itemsize
            + 2 * f_out_pad * 4
            + 1 * MiB)
    vmem_limit = int(min(max(2 * need, 32 * MiB), 48 * MiB))

    flops = 2 * n_rows_pad * n_cols_pad * f_out_pad
    bytes_accessed = int(
        a_pad.size * a_pad.dtype.itemsize
        + xw_pad.size * xw_pad.dtype.itemsize
        + n_rows_pad * f_out_pad * out_itemsize
    )

    return pl.pallas_call(
        kernel,
        out_shape=jax.ShapeDtypeStruct((n_rows_pad, f_out_pad), out_dtype),
        grid_spec=pltpu.PrefetchScalarGridSpec(
            num_scalar_prefetch=0,
            grid=(n_rows_pad // tm, n_cols_pad // tk),
            in_specs=[
                pl.BlockSpec((tm, tk), lambda i, k: (i, k)),
                xw_spec,
                pl.BlockSpec((1, f_out_pad), lambda i, k: (0, 0)),
            ],
            out_specs=pl.BlockSpec((tm, f_out_pad), lambda i, k: (i, 0)),
            scratch_shapes=[pltpu.VMEM((tm, f_out_pad), jnp.float32)],
        ),
        compiler_params=pltpu.CompilerParams(
            dimension_semantics=("parallel", "arbitrary"),
            vmem_limit_bytes=vmem_limit,
        ),
        cost_estimate=pl.CostEstimate(
            flops=flops,
            transcendentals=n_rows_pad * f_out_pad if epilogue == "log_softmax" else 0,
            bytes_accessed=bytes_accessed,
        ),
    )(a_pad, xw_pad, b_pad)


def fused_layer(a_pad, x_pad, w_pad, b_pad, epilogue, num_valid_cols, out_dtype):
    """One pallas_call per layer for tiny graphs (n_pad == 128)."""
    n_pad = a_pad.shape[0]
    f_in_pad = x_pad.shape[1]
    f_out_pad = w_pad.shape[1]
    kernel = functools.partial(
        fused_layer_kernel, epilogue=epilogue, num_valid_cols=num_valid_cols)
    return pl.pallas_call(
        kernel,
        out_shape=jax.ShapeDtypeStruct((n_pad, f_out_pad), out_dtype),
        grid_spec=pltpu.PrefetchScalarGridSpec(
            num_scalar_prefetch=0,
            grid=(1,),
            in_specs=[
                pl.BlockSpec((n_pad, n_pad), lambda i: (0, 0)),
                pl.BlockSpec((n_pad, f_in_pad), lambda i: (0, 0)),
                pl.BlockSpec((f_in_pad, f_out_pad), lambda i: (0, 0)),
                pl.BlockSpec((1, f_out_pad), lambda i: (0, 0)),
            ],
            out_specs=pl.BlockSpec((n_pad, f_out_pad), lambda i: (0, 0)),
        ),
    )(a_pad, x_pad, w_pad, b_pad)


# ---------------------------------------------------------------------------
# Glue: adjacency normalization, tile selection, parameter init, model forward
# ---------------------------------------------------------------------------
def build_norm_adj(edge_index, num_nodes):
    """Dense A_hat = D^-1/2 (A + I) D^-1/2, matching GCNConv's gcn_norm."""
    src = edge_index[0]
    dst = edge_index[1]
    a = jnp.zeros((num_nodes, num_nodes), jnp.float32)
    a = a.at[dst, src].add(1.0)                       # message src -> dst
    a = a + jnp.eye(num_nodes, dtype=jnp.float32)     # add self loops
    deg = jnp.sum(a, axis=1)
    d_inv_sqrt = 1.0 / jnp.sqrt(deg)
    return a * d_inv_sqrt[:, None] * d_inv_sqrt[None, :]


def _pick_tiles(n):
    """(tm, tk) for the A aggregation matmul; both multiples of 128."""
    # Row tile: large enough to sit near the HBM roofline, while keeping
    # >= 2 row tiles so both v7x TensorCores get work on the parallel axis.
    if n <= 256:
        tm = 128
    elif n <= 1024:
        tm = 256
    elif n <= 4096:
        tm = 512
    else:
        tm = 1024
    # K tile: whole K dim in one tile when small; otherwise the largest of
    # {2048,1024,512,256} whose column zero-padding stays modest.
    if n <= 2048:
        tk = _round_up(n, LANE)
    else:
        tk = 256
        for cand in (2048, 1024, 512, 256):
            if _round_up(n, cand) - n <= max(256, n // 8):
                tk = cand
                break
    return tm, tk


def init_gcn_params(key, num_features, num_classes, hidden, num_layers):
    """Deterministic Glorot-uniform weights, zero biases (GCNConv defaults)."""
    dims = [num_features] + [hidden] * (num_layers - 1) + [num_classes]
    params = []
    for i in range(num_layers):
        key, wkey = jax.random.split(key)
        fan_in, fan_out = dims[i], dims[i + 1]
        limit = jnp.sqrt(6.0 / (fan_in + fan_out))
        w = jax.random.uniform(wkey, (fan_in, fan_out), jnp.float32, -limit, limit)
        b = jnp.zeros((1, fan_out), jnp.float32)
        params.append((w, b))
    return params


def _pad_layer_params(w, b):
    fi, fo = w.shape
    fi_pad = _round_up(fi, LANE)
    fo_pad = _round_up(fo, LANE)
    w_pad = jnp.zeros((fi_pad, fo_pad), jnp.bfloat16).at[:fi, :fo].set(
        w.astype(jnp.bfloat16))
    b_pad = jnp.zeros((1, fo_pad), jnp.float32).at[:, :fo].set(b)
    return w_pad, b_pad, fo, fo_pad


def gcn_model_forward(x, edge_index, params):
    """Equivalent of GCNModel.forward: GCN stack then log_softmax(dim=1)."""
    n = x.shape[0]
    num_classes = params[-1][0].shape[1]
    num_layers = len(params)

    a_hat = build_norm_adj(edge_index, n)

    f_in = x.shape[1]
    f_in_pad = _round_up(f_in, LANE)

    # ---------------- tiny-graph path: one fused kernel per layer -----------
    if n <= 128:
        n_pad = 128
        a_pad = jnp.zeros((n_pad, n_pad), jnp.bfloat16).at[:n, :n].set(
            a_hat.astype(jnp.bfloat16))
        h = jnp.zeros((n_pad, f_in_pad), jnp.bfloat16).at[:n, :f_in].set(
            x.astype(jnp.bfloat16))
        for i, (w, b) in enumerate(params):
            w_pad, b_pad, fo, _ = _pad_layer_params(w, b)
            last = i == num_layers - 1
            epilogue = "log_softmax" if last else "relu"
            out_dtype = jnp.float32 if last else jnp.bfloat16
            h = fused_layer(a_pad, h, w_pad, b_pad, epilogue, fo, out_dtype)
        return h[:n, :num_classes]

    # ---------------- general path: XW kernel + tiled A aggregation ---------
    tm, tk = _pick_tiles(n)
    n_rows_pad = _round_up(n, tm)   # A rows / output rows
    n_cols_pad = _round_up(n, tk)   # A columns / XW rows

    a_pad = jnp.zeros((n_rows_pad, n_cols_pad), jnp.bfloat16)
    a_pad = a_pad.at[:n, :n].set(a_hat.astype(jnp.bfloat16))

    h = jnp.zeros((n_cols_pad, f_in_pad), jnp.bfloat16).at[:n, :f_in].set(
        x.astype(jnp.bfloat16))

    for i, (w, b) in enumerate(params):
        w_pad, b_pad, fo, fo_pad = _pad_layer_params(w, b)

        xw = matmul_xw(h, w_pad)                            # [n_cols_pad, fo_pad]

        last = i == num_layers - 1
        epilogue = "log_softmax" if last else "relu"
        out_dtype = jnp.float32 if last else jnp.bfloat16
        h_out = a_matmul(a_pad, xw, b_pad, tm, tk,
                         epilogue, fo, out_dtype)            # [n_rows_pad, fo_pad]

        if not last:
            # Re-pad rows to the column padding for the next layer's X@W.
            # All valid rows (< n) are preserved either way.
            if n_rows_pad >= n_cols_pad:
                h = h_out[:n_cols_pad]
            else:
                h = jnp.zeros((n_cols_pad, fo_pad), h_out.dtype).at[:n_rows_pad].set(h_out)
        else:
            h = h_out

    return h[:n, :num_classes]


# ---------------------------------------------------------------------------
if __name__ == "__main__":
    key = jax.random.PRNGKey(0)
    k_x, k_src, k_dst, k_p, k_x2, k_src2, k_dst2 = jax.random.split(key, 7)

    forward = jax.jit(gcn_model_forward)

    # ---- Small synthetic graph (module-consistent sizes): tiny fused path --
    N, NUM_FEATURES, NUM_CLASSES, HIDDEN, NUM_LAYERS = 16, 8, 8, 16, 2
    NUM_EDGES = 32

    x = jax.random.normal(k_x, (N, NUM_FEATURES), jnp.float32)
    src = jax.random.randint(k_src, (NUM_EDGES,), 0, N)
    dst = jax.random.randint(k_dst, (NUM_EDGES,), 0, N)
    edge_index = jnp.stack(
        [jnp.concatenate([src, dst]), jnp.concatenate([dst, src])], axis=0
    ).astype(jnp.int32)

    params = init_gcn_params(k_p, NUM_FEATURES, NUM_CLASSES, HIDDEN, NUM_LAYERS)

    out = forward(x, edge_index, params)
    jax.block_until_ready(out)
    assert out.shape == (N, NUM_CLASSES)
    row_sums = jnp.sum(jnp.exp(out), axis=1)
    assert bool(jnp.all(jnp.abs(row_sums - 1.0) < 1e-2))

    # ---- Medium synthetic graph: exercises the tiled A-aggregation path ----
    N2, NUM_EDGES2 = 300, 600
    x2 = jax.random.normal(k_x2, (N2, NUM_FEATURES), jnp.float32)
    src2 = jax.random.randint(k_src2, (NUM_EDGES2,), 0, N2)
    dst2 = jax.random.randint(k_dst2, (NUM_EDGES2,), 0, N2)
    edge_index2 = jnp.stack(
        [jnp.concatenate([src2, dst2]), jnp.concatenate([dst2, src2])], axis=0
    ).astype(jnp.int32)

    out2 = forward(x2, edge_index2, params)
    jax.block_until_ready(out2)
    assert out2.shape == (N2, NUM_CLASSES)
    row_sums2 = jnp.sum(jnp.exp(out2), axis=1)
    assert bool(jnp.all(jnp.abs(row_sums2 - 1.0) < 1e-2))

    print("KERNEL_OK")
</pallas_src>

<mosaic_0001>
module attributes {stable_mosaic.version = 11 : i64} {
  func.func @fused_layer_kernel(%arg0: i32, %arg1: memref<128x128xbf16, #tpu.memory_space<vmem>>, %arg2: memref<128x128xbf16, #tpu.memory_space<vmem>>, %arg3: memref<128x128xbf16, #tpu.memory_space<vmem>>, %arg4: memref<1x128xf32, #tpu.memory_space<vmem>>, %arg5: memref<128x128xbf16, #tpu.memory_space<vmem>>) attributes {dimension_semantics = [#tpu.dimension_semantics<arbitrary>], iteration_bounds = array<i64: 1>, scalar_prefetch = 0 : i64, scratch_operands = 0 : i64, tpu.core_type = #tpu.core_type<tc>, window_params = [{pipeline_mode = #tpu.pipeline_mode<synchronous>, transform_indices = @transform_0, window_bounds = array<i64: 128, 128>}, {pipeline_mode = #tpu.pipeline_mode<synchronous>, transform_indices = @transform_1, window_bounds = array<i64: 128, 128>}, {pipeline_mode = #tpu.pipeline_mode<synchronous>, transform_indices = @transform_2, window_bounds = array<i64: 128, 128>}, {pipeline_mode = #tpu.pipeline_mode<synchronous>, transform_indices = @transform_3, window_bounds = array<i64: 1, 128>}, {pipeline_mode = #tpu.pipeline_mode<synchronous>, transform_indices = @transform_4, window_bounds = array<i64: 128, 128>}]} {
    %c0 = arith.constant 0 : index
    %c0_0 = arith.constant 0 : index
    %0 = vector.load %arg2[%c0, %c0_0] : memref<128x128xbf16, #tpu.memory_space<vmem>>, vector<128x128xbf16>
    %c0_1 = arith.constant 0 : index
    %c0_2 = arith.constant 0 : index
    %1 = vector.load %arg3[%c0_1, %c0_2] : memref<128x128xbf16, #tpu.memory_space<vmem>>, vector<128x128xbf16>
    %cst = arith.constant dense<0.000000e+00> : vector<128x128xf32>
    %2 = tpu.matmul %0, %1, %cst {dimension_numbers = #tpu.dot_dimension_numbers<[1], [0], [0], [1], [0, 0, 1, 1], [], []>} : vector<128x128xbf16>, vector<128x128xbf16>, vector<128x128xf32> -> vector<128x128xf32>
    %c0_3 = arith.constant 0 : index
    %c0_4 = arith.constant 0 : index
    %3 = vector.load %arg1[%c0_3, %c0_4] : memref<128x128xbf16, #tpu.memory_space<vmem>>, vector<128x128xbf16>
    %4 = arith.truncf %2 : vector<128x128xf32> to vector<128x128xbf16>
    %cst_5 = arith.constant dense<0.000000e+00> : vector<128x128xf32>
    %5 = tpu.matmul %3, %4, %cst_5 {dimension_numbers = #tpu.dot_dimension_numbers<[1], [0], [0], [1], [0, 0, 1, 1], [], []>} : vector<128x128xbf16>, vector<128x128xbf16>, vector<128x128xf32> -> vector<128x128xf32>
    %c0_6 = arith.constant 0 : index
    %c0_7 = arith.constant 0 : index
    %6 = vector.load %arg4[%c0_6, %c0_7] : memref<1x128xf32, #tpu.memory_space<vmem>>, vector<1x128xf32>
    %7 = vector.broadcast %6 : vector<1x128xf32> to vector<128x128xf32>
    %8 = arith.addf %5, %7 : vector<128x128xf32>
    %cst_8 = arith.constant 0.000000e+00 : f32
    %9 = vector.broadcast %cst_8 : f32 to vector<128x128xf32>
    %10 = arith.maximumf %8, %9 : vector<128x128xf32>
    %11 = arith.truncf %10 : vector<128x128xf32> to vector<128x128xbf16>
    %c0_9 = arith.constant 0 : index
    %c0_10 = arith.constant 0 : index
    %12 = vector.load %arg5[%c0_9, %c0_10] : memref<128x128xbf16, #tpu.memory_space<vmem>>, vector<128x128xbf16>
    tpu.vector_store %arg5[%c0_9, %c0_10], %11 {strides = array<i32>} : memref<128x128xbf16, #tpu.memory_space<vmem>>, vector<128x128xbf16>,
    return
  }
  func.func @transform_0(%arg0: i32) -> (i32, i32) {
    %c0_i32 = arith.constant 0 : i32
    %c0_i32_0 = arith.constant 0 : i32
    %c0_i32_1 = arith.constant 0 : i32
    return %c0_i32, %c0_i32_0 : i32, i32
  }
  func.func @transform_1(%arg0: i32) -> (i32, i32) {
    %c0_i32 = arith.constant 0 : i32
    %c0_i32_0 = arith.constant 0 : i32
    %c0_i32_1 = arith.constant 0 : i32
    return %c0_i32, %c0_i32_0 : i32, i32
  }
  func.func @transform_2(%arg0: i32) -> (i32, i32) {
    %c0_i32 = arith.constant 0 : i32
    %c0_i32_0 = arith.constant 0 : i32
    %c0_i32_1 = arith.constant 0 : i32
    return %c0_i32, %c0_i32_0 : i32, i32
  }
  func.func @transform_3(%arg0: i32) -> (i32, i32) {
    %c0_i32 = arith.constant 0 : i32
    %c0_i32_0 = arith.constant 0 : i32
    %c0_i32_1 = arith.constant 0 : i32
    return %c0_i32, %c0_i32_0 : i32, i32
  }
  func.func @transform_4(%arg0: i32) -> (i32, i32) {
    %c0_i32 = arith.constant 0 : i32
    %c0_i32_0 = arith.constant 0 : i32
    %c0_i32_1 = arith.constant 0 : i32
    return %c0_i32, %c0_i32_0 : i32, i32
  }
}

module attributes {stable_mosaic.version = 11 : i64} {
  func.func @fused_layer_kernel(%arg0: i32, %arg1: memref<128x128xbf16, #tpu.memory_space<vmem>>, %arg2: memref<128x128xbf16, #tpu.memory_space<vmem>>, %arg3: memref<128x128xbf16, #tpu.memory_space<vmem>>, %arg4: memref<1x128xf32, #tpu.memory_space<vmem>>, %arg5: memref<128x128xf32, #tpu.memory_space<vmem>>) attributes {dimension_semantics = [#tpu.dimension_semantics<arbitrary>], iteration_bounds = array<i64: 1>, scalar_prefetch = 0 : i64, scratch_operands = 0 : i64, tpu.core_type = #tpu.core_type<tc>, window_params = [{pipeline_mode = #tpu.pipeline_mode<synchronous>, transform_indices = @transform_0, window_bounds = array<i64: 128, 128>}, {pipeline_mode = #tpu.pipeline_mode<synchronous>, transform_indices = @transform_1, window_bounds = array<i64: 128, 128>}, {pipeline_mode = #tpu.pipeline_mode<synchronous>, transform_indices = @transform_2, window_bounds = array<i64: 128, 128>}, {pipeline_mode = #tpu.pipeline_mode<synchronous>, transform_indices = @transform_3, window_bounds = array<i64: 1, 128>}, {pipeline_mode = #tpu.pipeline_mode<synchronous>, transform_indices = @transform_4, window_bounds = array<i64: 128, 128>}]} {
    %c0 = arith.constant 0 : index
    %c0_0 = arith.constant 0 : index
    %0 = vector.load %arg2[%c0, %c0_0] : memref<128x128xbf16, #tpu.memory_space<vmem>>, vector<128x128xbf16>
    %c0_1 = arith.constant 0 : index
    %c0_2 = arith.constant 0 : index
    %1 = vector.load %arg3[%c0_1, %c0_2] : memref<128x128xbf16, #tpu.memory_space<vmem>>, vector<128x128xbf16>
    %cst = arith.constant dense<0.000000e+00> : vector<128x128xf32>
    %2 = tpu.matmul %0, %1, %cst {dimension_numbers = #tpu.dot_dimension_numbers<[1], [0], [0], [1], [0, 0, 1, 1], [], []>} : vector<128x128xbf16>, vector<128x128xbf16>, vector<128x128xf32> -> vector<128x128xf32>
    %c0_3 = arith.constant 0 : index
    %c0_4 = arith.constant 0 : index
    %3 = vector.load %arg1[%c0_3, %c0_4] : memref<128x128xbf16, #tpu.memory_space<vmem>>, vector<128x128xbf16>
    %4 = arith.truncf %2 : vector<128x128xf32> to vector<128x128xbf16>
    %cst_5 = arith.constant dense<0.000000e+00> : vector<128x128xf32>
    %5 = tpu.matmul %3, %4, %cst_5 {dimension_numbers = #tpu.dot_dimension_numbers<[1], [0], [0], [1], [0, 0, 1, 1], [], []>} : vector<128x128xbf16>, vector<128x128xbf16>, vector<128x128xf32> -> vector<128x128xf32>
    %c0_6 = arith.constant 0 : index
    %c0_7 = arith.constant 0 : index
    %6 = vector.load %arg4[%c0_6, %c0_7] : memref<1x128xf32, #tpu.memory_space<vmem>>, vector<1x128xf32>
    %7 = vector.broadcast %6 : vector<1x128xf32> to vector<128x128xf32>
    %8 = arith.addf %5, %7 : vector<128x128xf32>
    %9 = tpu.iota {dimensions = array<i32: 1>} : vector<128x128xi32>
    %c8_i32 = arith.constant 8 : i32
    %10 = vector.broadcast %c8_i32 : i32 to vector<128x128xi32>
    %11 = arith.cmpi slt, %9, %10 : vector<128x128xi32>
    %cst_8 = arith.constant -1.000000e+30 : f32
    %12 = vector.broadcast %cst_8 : f32 to vector<128x128xf32>
    %13 = arith.select %11, %8, %12 : vector<128x128xi1>, vector<128x128xf32>
    %cst_9 = arith.constant dense<0xFF800000> : vector<128xf32>
    %14 = vector.multi_reduction <maximumf>, %13, %cst_9 [1] : vector<128x128xf32> to vector<128xf32>
    %15 = vector.shape_cast %14 : vector<128xf32> to vector<128x1xf32>
    %16 = vector.broadcast %15 : vector<128x1xf32> to vector<128x128xf32>
    %17 = arith.subf %13, %16 : vector<128x128xf32>
    %18 = math.exp %17 : vector<128x128xf32>
    %cst_10 = arith.constant 0.000000e+00 : f32
    %19 = vector.broadcast %cst_10 : f32 to vector<128x128xf32>
    %20 = arith.select %11, %18, %19 : vector<128x128xi1>, vector<128x128xf32>
    %cst_11 = arith.constant dense<0.000000e+00> : vector<128xf32>
    %21 = vector.multi_reduction <add>, %20, %cst_11 [1] : vector<128x128xf32> to vector<128xf32>
    %22 = vector.shape_cast %21 : vector<128xf32> to vector<128x1xf32>
    %23 = math.log %22 : vector<128x1xf32>
    %24 = vector.broadcast %23 : vector<128x1xf32> to vector<128x128xf32>
    %25 = arith.subf %17, %24 : vector<128x128xf32>
    %c0_12 = arith.constant 0 : index
    %c0_13 = arith.constant 0 : index
    %26 = vector.load %arg5[%c0_12, %c0_13] : memref<128x128xf32, #tpu.memory_space<vmem>>, vector<128x128xf32>
    tpu.vector_store %arg5[%c0_12, %c0_13], %25 {strides = array<i32>} : memref<128x128xf32, #tpu.memory_space<vmem>>, vector<128x128xf32>,
    return
  }
  func.func @transform_0(%arg0: i32) -> (i32, i32) {
    %c0_i32 = arith.constant 0 : i32
    %c0_i32_0 = arith.constant 0 : i32
    %c0_i32_1 = arith.constant 0 : i32
    return %c0_i32, %c0_i32_0 : i32, i32
  }
  func.func @transform_1(%arg0: i32) -> (i32, i32) {
    %c0_i32 = arith.constant 0 : i32
    %c0_i32_0 = arith.constant 0 : i32
    %c0_i32_1 = arith.constant 0 : i32
    return %c0_i32, %c0_i32_0 : i32, i32
  }
  func.func @transform_2(%arg0: i32) -> (i32, i32) {
    %c0_i32 = arith.constant 0 : i32
    %c0_i32_0 = arith.constant 0 : i32
    %c0_i32_1 = arith.constant 0 : i32
    return %c0_i32, %c0_i32_0 : i32, i32
  }
  func.func @transform_3(%arg0: i32) -> (i32, i32) {
    %c0_i32 = arith.constant 0 : i32
    %c0_i32_0 = arith.constant 0 : i32
    %c0_i32_1 = arith.constant 0 : i32
    return %c0_i32, %c0_i32_0 : i32, i32
  }
  func.func @transform_4(%arg0: i32) -> (i32, i32) {
    %c0_i32 = arith.constant 0 : i32
    %c0_i32_0 = arith.constant 0 : i32
    %c0_i32_1 = arith.constant 0 : i32
    return %c0_i32, %c0_i32_0 : i32, i32
  }
}

</mosaic_0001>

<bundles_post_ra>
// kernel: gcn_model_forward.3
= control target key start
LH: loop header
LB: loop body
LE: loop exit
PB: predicated region body
PF: predicated region fallthrough
CT: control target
= control target key end

     0   :  { %v319_v48 = vlaneseq  ;;  %s1070_s2 = inlined_call_operand.vmem [shape: bf16[128,128], index: 2, kind: input, shape index: {}]   ;;  %s1071_s1 = inlined_call_operand.vmem [shape: bf16[128,128], index: 1, kind: input, shape index: {}]   ;;  %s1072_s3 = inlined_call_operand.vmem [shape: f32[1,128], index: 3, kind: input, shape index: {}]   ;;  %s1073_s0 = inlined_call_operand.vmem [shape: bf16[128,128], index: 0, kind: input, shape index: {}]   ;;  %s1074_s4 = inlined_call_operand.vmem [shape: f32[128,128], index: 4, kind: output, shape index: {}]  }
   0x1   :  { %v645_v0 = vld [vmem:[%s1070_s2 + $0x38] sm:$0xff]  ;;  %v644_v1 = vld [vmem:[%s1070_s2 + $0x30] sm:$0xff]  ;;  %v643_v2 = vld [vmem:[%s1070_s2 + $0x28] sm:$0xff] }
   0x2   :  { %654 = vmatpush.bf16.msra.mxu2 %v645_v0  ;;  %145 = vmatpush.bf16.msra.mxu0 %v645_v0  ;;  %v642_v3 = vld [vmem:[%s1070_s2 + $0x20] sm:$0xff]  ;;  %v641_v4 = vld [vmem:[%s1070_s2 + $0x18] sm:$0xff]  ;;  %v640_v5 = vld [vmem:[%s1070_s2 + $0x10] sm:$0xff]  ;;  %v832_v49 = vand.u32 127, %v319_v48 }
   0x3   :  { %v639_v6 = vld [vmem:[%s1070_s2 + $0x8] sm:$0xff]  ;;  %v638_v7 = vld [vmem:[%s1070_s2] sm:$0xff]  ;;  %v636_v12 = vld [vmem:[%s1071_s1 + $0x30] sm:$0xff] }
   0x4   :  { %v634_v8 = vld [vmem:[%s1071_s1 + $0x20] sm:$0xff]  ;;  %v635_v10 = vld [vmem:[%s1071_s1 + $0x28] sm:$0xff]  ;;  %v632_v13 = vld [vmem:[%s1071_s1 + $0x10] sm:$0xff]  ;;  %vm321_vm0 = vcmp.lt.s32.totalorder %v832_v49, 8 }
   0x5   :  { %v630_v9 = vld [vmem:[%s1071_s1] sm:$0xff]  ;;  %v631_v11 = vld [vmem:[%s1071_s1 + $0x8] sm:$0xff]  ;;  %v637_v14 = vld [vmem:[%s1071_s1 + $0x38] sm:$0xff] }
   0x6   :  { %655 = vmatpush.bf16.msra.mxu2 %v644_v1  ;;  %146 = vmatpush.bf16.msra.mxu0 %v644_v1  ;;  %v633_v15 = vld [vmem:[%s1071_s1 + $0x18] sm:$0xff]  ;;  %v646_v40 = vld [vmem:[%s1073_s0] sm:$0xff]  ;;  %v647_v42 = vld [vmem:[%s1073_s0 + $0x8] sm:$0xff] }
   0x7   :  { %v650_v41 = vld [vmem:[%s1073_s0 + $0x20] sm:$0xff]  ;;  %v651_v43 = vld [vmem:[%s1073_s0 + $0x28] sm:$0xff]  ;;  %v648_v44 = vld [vmem:[%s1073_s0 + $0x10] sm:$0xff] }
   0x8   :  { %v652_v45 = vld [vmem:[%s1073_s0 + $0x30] sm:$0xff]  ;;  %v649_v46 = vld [vmem:[%s1073_s0 + $0x18] sm:$0xff]  ;;  %v670_v50 = vld [vmem:[%s1072_s3] ss:$0 sm:$0xff] }
   0x9   :  { %v653_v47 = vld [vmem:[%s1073_s0 + $0x38] sm:$0xff] }
   0xa   :  { %656 = vmatpush.bf16.msra.mxu2 %v643_v2  ;;  %147 = vmatpush.bf16.msra.mxu0 %v643_v2 }
   0xe   :  { %657 = vmatpush.bf16.msra.mxu2 %v642_v3  ;;  %148 = vmatpush.bf16.msra.mxu0 %v642_v3 }
  0x12   :  { %658 = vmatpush.bf16.msra.mxu2 %v641_v4  ;;  %149 = vmatpush.bf16.msra.mxu0 %v641_v4 }
  0x16   :  { %659 = vmatpush.bf16.msra.mxu2 %v640_v5  ;;  %150 = vmatpush.bf16.msra.mxu0 %v640_v5 }
  0x1a   :  { %660 = vmatpush.bf16.msra.mxu2 %v639_v6  ;;  %151 = vmatpush.bf16.msra.mxu0 %v639_v6 }
  0x1e   :  { %661 = vmatpush.bf16.msra.mxu2 %v638_v7  ;;  %152 = vmatpush.bf16.msra.mxu0 %v638_v7 }
  0x21   :  { %173 = vmatmul.bf16.vlgmr.msra.gmra.mxu2 %v634_v8  ;;  %153 = vmatmul.bf16.vlgmr.msra.gmra.mxu0 %v630_v9 }
  0x31   :  { %178 = vmatmul.bf16.gmra.mxu2 %v635_v10  ;;  %158 = vmatmul.bf16.gmra.mxu0 %v631_v11 }
  0x41   :  { %183 = vmatmul.bf16.gmra.mxu2 %v636_v12  ;;  %163 = vmatmul.bf16.gmra.mxu0 %v632_v13 }
  0x51   :  { %188 = vmatmul.bf16.gmra.mxu2 %v637_v14  ;;  %168 = vmatmul.bf16.gmra.mxu0 %v633_v15 }
  0x9e   :  { %v154_v17 = vpop.f32.mrf.mxu0 }
  0xa4   :  { %v174_v16 = vpop.f32.mrf.mxu2 }
  0xa6   :  { %v156_v19 = vpop.f32.mrf.mxu0 }
  0xa7   :  { %v210_v39 = vpack.c.bf16 %v156_v19, %v154_v17 }
  0xac   :  { %v176_v18 = vpop.f32.mrf.mxu2 }
  0xad   :  { %v214_v34 = vpack.c.bf16 %v176_v18, %v174_v16 }
  0xae   :  { %v159_v21 = vpop.f32.mrf.mxu0 }
  0xb4   :  { %v179_v20 = vpop.f32.mrf.mxu2 }
  0xb6   :  { %v161_v23 = vpop.f32.mrf.mxu0 }
  0xb7   :  { %v211_v38 = vpack.c.bf16 %v161_v23, %v159_v21 }
  0xbc   :  { %v181_v22 = vpop.f32.mrf.mxu2 }
  0xbd   :  { %v215_v33 = vpack.c.bf16 %v181_v22, %v179_v20 }
  0xbe   :  { %v164_v25 = vpop.f32.mrf.mxu0 }
  0xc4   :  { %v184_v24 = vpop.f32.mrf.mxu2 }
  0xc6   :  { %v166_v28 = vpop.f32.mrf.mxu0 }
  0xc7   :  { %v212_v37 = vpack.c.bf16 %v166_v28, %v164_v25 }
  0xcc   :  { %v186_v26 = vpop.f32.mrf.mxu2 }
  0xcd   :  { %v216_v32 = vpack.c.bf16 %v186_v26, %v184_v24 }
  0xce   :  { %v169_v31 = vpop.f32.mrf.mxu0 }
  0xd4   :  { %v189_v27 = vpop.f32.mrf.mxu2 }
  0xd6   :  { %v171_v35 = vpop.f32.mrf.mxu0 }
  0xd7   :  { %v213_v36 = vpack.c.bf16 %v171_v35, %v169_v31 }
  0xdc   :  { %v191_v29 = vpop.f32.mrf.mxu2 }
  0xdd   :  { %v217_v30 = vpack.c.bf16 %v191_v29, %v189_v27 }
  0xdf   :  { %270 = vmatpush.bf16.msra.mxu1 %v217_v30  ;;  %662 = vmatpush.bf16.msra.mxu3 %v217_v30 }
  0xe3   :  { %271 = vmatpush.bf16.msra.mxu1 %v216_v32  ;;  %663 = vmatpush.bf16.msra.mxu3 %v216_v32 }
  0xe7   :  { %272 = vmatpush.bf16.msra.mxu1 %v215_v33  ;;  %664 = vmatpush.bf16.msra.mxu3 %v215_v33 }
  0xeb   :  { %273 = vmatpush.bf16.msra.mxu1 %v214_v34  ;;  %665 = vmatpush.bf16.msra.mxu3 %v214_v34 }
  0xef   :  { %274 = vmatpush.bf16.msra.mxu1 %v213_v36  ;;  %666 = vmatpush.bf16.msra.mxu3 %v213_v36 }
  0xf3   :  { %275 = vmatpush.bf16.msra.mxu1 %v212_v37  ;;  %667 = vmatpush.bf16.msra.mxu3 %v212_v37 }
  0xf7   :  { %276 = vmatpush.bf16.msra.mxu1 %v211_v38  ;;  %668 = vmatpush.bf16.msra.mxu3 %v211_v38 }
  0xfb   :  { %277 = vmatpush.bf16.msra.mxu1 %v210_v39  ;;  %669 = vmatpush.bf16.msra.mxu3 %v210_v39 }
  0xfe   :  { %278 = vmatmul.bf16.vlgmr.msra.gmra.mxu1 %v646_v40  ;;  %298 = vmatmul.bf16.vlgmr.msra.gmra.mxu3 %v650_v41 }
 0x10e   :  { %283 = vmatmul.bf16.gmra.mxu1 %v647_v42  ;;  %303 = vmatmul.bf16.gmra.mxu3 %v651_v43 }
 0x11e   :  { %288 = vmatmul.bf16.gmra.mxu1 %v648_v44  ;;  %308 = vmatmul.bf16.gmra.mxu3 %v652_v45 }
 0x12e   :  { %293 = vmatmul.bf16.gmra.mxu1 %v649_v46  ;;  %313 = vmatmul.bf16.gmra.mxu3 %v653_v47 }
 0x17b   :  { %v279_v51 = vpop.f32.mrf.mxu1 }
 0x17c   :  { %v280_v52 = vadd.f32 %v670_v50, %v279_v51 }
 0x17e   :  { %v840_v53 = vsel %vm321_vm0, %v280_v52, -1e+30 }
 0x17f   :  { %338 = vmax.xlane.f32.xlu0 %v840_v53 }
 0x181   :  { %v299_v54 = vpop.f32.mrf.mxu3 }
 0x182   :  { %v300_v55 = vadd.f32 %v670_v50, %v299_v54 }
 0x183   :  { %v281_v56 = vpop.f32.mrf.mxu1 }
 0x184   :  { %v282_v57 = vadd.f32 %v670_v50, %v281_v56  ;;  %v330_v58 = vsel %vm321_vm0, %v300_v55, -1e+30 }
 0x185   :  { %354 = vmax.xlane.f32.xlu2 %v330_v58 }
 0x186   :  { %v323_v59 = vsel %vm321_vm0, %v282_v57, -1e+30 }
 0x187   :  { %340 = vmax.xlane.f32.xlu0 %v323_v59 }
 0x189   :  { %v301_v60 = vpop.f32.mrf.mxu3 }
 0x18a   :  { %v302_v61 = vadd.f32 %v670_v50, %v301_v60 }
 0x18b   :  { %v284_v62 = vpop.f32.mrf.mxu1 }
 0x18c   :  { %v285_v63 = vadd.f32 %v670_v50, %v284_v62  ;;  %v853_v1 = vsel %vm321_vm0, %v302_v61, -1e+30 }
 0x18e   :  { %v849_v0 = vsel %vm321_vm0, %v285_v63, -1e+30 }
 0x18f   :  { %342 = vmax.xlane.f32.xlu1 %v849_v0  ;;  %356 = vmax.xlane.f32.xlu0 %v853_v1 }
 0x191   :  { %v304_v2 = vpop.f32.mrf.mxu3 }
 0x192   :  { %v305_v3 = vadd.f32 %v670_v50, %v304_v2 }
 0x193   :  { %v286_v4 = vpop.f32.mrf.mxu1 }
 0x194   :  { %v859_v5 = vsel %vm321_vm0, %v305_v3, -1e+30  ;;  %v287_v7 = vadd.f32 %v670_v50, %v286_v4 }
 0x196   :  { %v869_v11 = vsel %vm321_vm0, %v287_v7, -1e+30 }
 0x197   :  { %358 = vmax.xlane.f32.xlu1 %v859_v5 }
 0x199   :  { %v306_v6 = vpop.f32.mrf.mxu3 }
 0x19a   :  { %v307_v8 = vadd.f32 %v670_v50, %v306_v6 }
 0x19b   :  { %v289_v9 = vpop.f32.mrf.mxu1 }
 0x19c   :  { %v864_v10 = vsel %vm321_vm0, %v307_v8, -1e+30  ;;  %v290_v12 = vadd.f32 %v670_v50, %v289_v9 }
 0x19d   :  { %360 = vmax.xlane.f32.xlu2 %v864_v10 }
 0x19e   :  { %v874_v16 = vsel %vm321_vm0, %v290_v12, -1e+30 }
 0x19f   :  { %344 = vmax.xlane.f32.xlu1 %v869_v11 }
 0x1a1   :  { %v309_v13 = vpop.f32.mrf.mxu3 }
 0x1a2   :  { %v310_v14 = vadd.f32 %v670_v50, %v309_v13 }
 0x1a3   :  { %v291_v15 = vpop.f32.mrf.mxu1 }
 0x1a4   :  { %v878_v17 = vsel %vm321_vm0, %v310_v14, -1e+30  ;;  %v292_v18 = vadd.f32 %v670_v50, %v291_v15 }
 0x1a5   :  { %346 = vmax.xlane.f32.xlu2 %v874_v16  ;;  %362 = vmax.xlane.f32.xlu0 %v878_v17 }
 0x1a6   :  { %v884_v22 = vsel %vm321_vm0, %v292_v18, -1e+30 }
 0x1a9   :  { %v311_v19 = vpop.f32.mrf.mxu3 }
 0x1aa   :  { %v312_v31 = vadd.f32 %v670_v50, %v311_v19 }
 0x1ab   :  { %v294_v20 = vpop.f32.mrf.mxu1 }
 0x1ac   :  { %v295_v21 = vadd.f32 %v670_v50, %v294_v20  ;;  %v909_v34 = vsel %vm321_vm0, %v312_v31, -1e+30 }
 0x1ad   :  { %348 = vmax.xlane.f32.xlu2 %v884_v22 }
 0x1ae   :  { %v889_v23 = vsel %vm321_vm0, %v295_v21, -1e+30 }
 0x1af   :  { %350 = vmax.xlane.f32.xlu0 %v889_v23 }
 0x1b1   :  { %v314_v24 = vpop.f32.mrf.mxu3 }
 0x1b2   :  { %v315_v25 = vadd.f32 %v670_v50, %v314_v24 }
 0x1b3   :  { %v296_v26 = vpop.f32.mrf.mxu1 }
 0x1b4   :  { %v297_v27 = vadd.f32 %v670_v50, %v296_v26  ;;  %v894_v28 = vsel %vm321_vm0, %v315_v25, -1e+30 }
 0x1b5   :  { %366 = vmax.xlane.f32.xlu2 %v894_v28 }
 0x1b6   :  { %v899_v29 = vsel %vm321_vm0, %v297_v27, -1e+30 }
 0x1b7   :  { %352 = vmax.xlane.f32.xlu1 %v899_v29 }
 0x1b9   :  { %v316_v30 = vpop.f32.mrf.mxu3 }
 0x1ba   :  { %v317_v32 = vadd.f32 %v670_v50, %v316_v30 }
 0x1bc   :  { %v904_v33 = vsel %vm321_vm0, %v317_v32, -1e+30 }
 0x1bd   :  { %368 = vmax.xlane.f32.xlu0 %v904_v33 }
 0x1bf   :  { %364 = vmax.xlane.f32.xlu1 %v909_v34 }
 0x1f2   :  { %v339_v35 = vpop.xlane.xlu0 %338 }
 0x1f3   :  { %v913_v36 = vsub.f32 %v840_v53, %v339_v35 }
 0x1f5   :  { %v386_v37 = vmul.f32 1.442695, %v913_v36 }
 0x1f7   :  { %671 = vpow2.f32 %v386_v37 }
 0x1f8   :  { %v355_v38 = vpop.xlane.xlu2 %354 }
 0x1f9   :  { %v916_v39 = vsub.f32 %v330_v58, %v355_v38 }
 0x1fa   :  { %v341_v40 = vpop.xlane.xlu0 %340 }
 0x1fb   :  { %v402_v41 = vmul.f32 1.442695, %v916_v39  ;;  %v919_v42 = vsub.f32 %v323_v59, %v341_v40 }
 0x1fd   :  { %v672_v43 = vpop.eup %671  ;;  %673 = vpow2.f32 %v402_v41  ;;  %v388_v44 = vmul.f32 1.442695, %v919_v42 }
 0x1fe   :  { %v418_v45 = vsel %vm321_vm0, %v672_v43, 0.0 }
 0x1ff   :  { %675 = vpow2.f32 %v388_v44  ;;  %434 = vadd.xlane.f32.xlu1 %v418_v45 }
 0x202   :  { %v343_v46 = vpop.xlane.xlu1 %342  ;;  %v357_v47 = vpop.xlane.xlu0 %356 }
 0x203   :  { %v674_v48 = vpop.eup %673  ;;  %v925_v50 = vsub.f32 %v849_v0, %v343_v46  ;;  %v928_v51 = vsub.f32 %v853_v1, %v357_v47 }
 0x204   :  { %v426_v52 = vsel %vm321_vm0, %v674_v48, 0.0 }
 0x205   :  { %v676_v53 = vpop.eup %675  ;;  %v390_v54 = vmul.f32 1.442695, %v925_v50  ;;  %v404_v55 = vmul.f32 1.442695, %v928_v51  ;;  %450 = vadd.xlane.f32.xlu0 %v426_v52 }
 0x206   :  { %v419_v56 = vsel %vm321_vm0, %v676_v53, 0.0 }
 0x207   :  { %677 = vpow2.f32 %v390_v54  ;;  %436 = vadd.xlane.f32.xlu2 %v419_v56 }
 0x208   :  { %679 = vpow2.f32 %v404_v55 }
 0x20a   :  { %v359_v57 = vpop.xlane.xlu1 %358 }
 0x20b   :  { %v937_v58 = vsub.f32 %v859_v5, %v359_v57 }
 0x20d   :  { %v678_v59 = vpop.eup %677  ;;  %v406_v60 = vmul.f32 1.442695, %v937_v58 }
 0x20e   :  { %v680_v61 = vpop.eup %679  ;;  %v420_v62 = vsel %vm321_vm0, %v678_v59, 0.0 }
 0x20f   :  { %681 = vpow2.f32 %v406_v60  ;;  %438 = vadd.xlane.f32.xlu0 %v420_v62  ;;  %v427_v63 = vsel %vm321_vm0, %v680_v61, 0.0 }
 0x210   :  { %452 = vadd.xlane.f32.xlu1 %v427_v63  ;;  %v361_v0 = vpop.xlane.xlu2 %360 }
 0x211   :  { %v945_v1 = vsub.f32 %v864_v10, %v361_v0 }
 0x212   :  { %v345_v2 = vpop.xlane.xlu1 %344 }
 0x213   :  { %v408_v3 = vmul.f32 1.442695, %v945_v1  ;;  %v949_v4 = vsub.f32 %v869_v11, %v345_v2 }
 0x215   :  { %v682_v5 = vpop.eup %681  ;;  %683 = vpow2.f32 %v408_v3  ;;  %v392_v6 = vmul.f32 1.442695, %v949_v4 }
 0x216   :  { %v428_v7 = vsel %vm321_vm0, %v682_v5, 0.0 }
 0x217   :  { %685 = vpow2.f32 %v392_v6  ;;  %454 = vadd.xlane.f32.xlu2 %v428_v7 }
 0x218   :  { %v347_v8 = vpop.xlane.xlu2 %346  ;;  %v363_v9 = vpop.xlane.xlu0 %362 }
 0x219   :  { %v955_v10 = vsub.f32 %v874_v16, %v347_v8  ;;  %v958_v12 = vsub.f32 %v878_v17, %v363_v9 }
 0x21b   :  { %v684_v13 = vpop.eup %683  ;;  %v394_v11 = vmul.f32 1.442695, %v955_v10  ;;  %v410_v14 = vmul.f32 1.442695, %v958_v12 }
 0x21c   :  { %v429_v15 = vsel %vm321_vm0, %v684_v13, 0.0 }
 0x21d   :  { %v686_v18 = vpop.eup %685  ;;  %687 = vpow2.f32 %v394_v11  ;;  %456 = vadd.xlane.f32.xlu0 %v429_v15 }
 0x21e   :  { %689 = vpow2.f32 %v410_v14  ;;  %v421_v19 = vsel %vm321_vm0, %v686_v18, 0.0 }
 0x21f   :  { %440 = vadd.xlane.f32.xlu1 %v421_v19 }
 0x220   :  { %v349_v16 = vpop.xlane.xlu2 %348 }
 0x221   :  { %v967_v17 = vsub.f32 %v884_v22, %v349_v16 }
 0x222   :  { %v351_v20 = vpop.xlane.xlu0 %350 }
 0x223   :  { %v688_v21 = vpop.eup %687  ;;  %v396_v24 = vmul.f32 1.442695, %v967_v17  ;;  %v971_v25 = vsub.f32 %v889_v23, %v351_v20 }
 0x224   :  { %v690_v26 = vpop.eup %689  ;;  %v422_v27 = vsel %vm321_vm0, %v688_v21, 0.0 }
 0x225   :  { %691 = vpow2.f32 %v396_v24  ;;  %v398_v30 = vmul.f32 1.442695, %v971_v25  ;;  %442 = vadd.xlane.f32.xlu2 %v422_v27  ;;  %v430_v31 = vsel %vm321_vm0, %v690_v26, 0.0 }
 0x227   :  { %693 = vpow2.f32 %v398_v30  ;;  %458 = vadd.xlane.f32.xlu1 %v430_v31 }
 0x228   :  { %v367_v22 = vpop.xlane.xlu2 %366 }
 0x229   :  { %v979_v32 = vsub.f32 %v894_v28, %v367_v22 }
 0x22a   :  { %v353_v35 = vpop.xlane.xlu1 %352 }
 0x22b   :  { %v692_v23 = vpop.eup %691  ;;  %v414_v37 = vmul.f32 1.442695, %v979_v32  ;;  %v983_v38 = vsub.f32 %v899_v29, %v353_v35 }
 0x22c   :  { %v423_v40 = vsel %vm321_vm0, %v692_v23, 0.0 }
 0x22d   :  { %v694_v41 = vpop.eup %693  ;;  %695 = vpow2.f32 %v414_v37  ;;  %v400_v43 = vmul.f32 1.442695, %v983_v38  ;;  %444 = vadd.xlane.f32.xlu0 %v423_v40 }
 0x22e   :  { %v424_v44 = vsel %vm321_vm0, %v694_v41, 0.0 }
 0x22f   :  { %697 = vpow2.f32 %v400_v43  ;;  %446 = vadd.xlane.f32.xlu1 %v424_v44 }
 0x230   :  { %v369_v28 = vpop.xlane.xlu0 %368 }
 0x231   :  { %v991_v45 = vsub.f32 %v904_v33, %v369_v28 }
 0x232   :  { %v365_v46 = vpop.xlane.xlu1 %364 }
 0x233   :  { %v696_v29 = vpop.eup %695  ;;  %v416_v47 = vmul.f32 1.442695, %v991_v45  ;;  %v995_v48 = vsub.f32 %v909_v34, %v365_v46 }
 0x234   :  { %v432_v52 = vsel %vm321_vm0, %v696_v29, 0.0 }
 0x235   :  { %v698_v53 = vpop.eup %697  ;;  %699 = vpow2.f32 %v416_v47  ;;  %v412_v54 = vmul.f32 1.442695, %v995_v48  ;;  %462 = vadd.xlane.f32.xlu0 %v432_v52 }
 0x236   :  { %v425_v55 = vsel %vm321_vm0, %v698_v53, 0.0 }
 0x237   :  { %701 = vpow2.f32 %v412_v54  ;;  %448 = vadd.xlane.f32.xlu2 %v425_v55 }
 0x23b   :  { %v700_v33 = vpop.eup %699 }
 0x23c   :  { %v433_v56 = vsel %vm321_vm0, %v700_v33, 0.0 }
 0x23d   :  { %v702_v57 = vpop.eup %701  ;;  %464 = vadd.xlane.f32.xlu1 %v433_v56 }
 0x23e   :  { %v431_v34 = vsel %vm321_vm0, %v702_v57, 0.0 }
 0x23f   :  { %460 = vadd.xlane.f32.xlu2 %v431_v34 }
 0x272   :  { %v435_v59 = vpop.xlane.xlu1 %434 }
 0x273   :  { %703 = vlog2.f32 %v435_v59 }
 0x278   :  { %v451_v60 = vpop.xlane.xlu0 %450 }
 0x279   :  { %v704_v61 = vpop.eup %703  ;;  %705 = vlog2.f32 %v451_v60 }
 0x27a   :  { %v467_v62 = vmul.f32 0.6931472, %v704_v61  ;;  %v437_v63 = vpop.xlane.xlu2 %436 }
 0x27b   :  { %707 = vlog2.f32 %v437_v63 }
 0x27c   :  { %v498_v0 = vsub.f32 %v913_v36, %v467_v62 }
 0x27e   :  { %514 = vst [vmem:[%s1074_s4] sm:$0xff] %v498_v0 }
 0x27f   :  { %v706_v2 = vpop.eup %705 }
 0x280   :  { %v483_v3 = vmul.f32 0.6931472, %v706_v2 }
 0x281   :  { %v708_v5 = vpop.eup %707 }
 0x282   :  { %v506_v49 = vsub.f32 %v916_v39, %v483_v3  ;;  %v469_v6 = vmul.f32 0.6931472, %v708_v5  ;;  %v439_v7 = vpop.xlane.xlu0 %438 }
 0x283   :  { %v453_v8 = vpop.xlane.xlu1 %452  ;;  %709 = vlog2.f32 %v439_v7 }
 0x284   :  { %522 = vst [vmem:[%s1074_s4 + $0x40] sm:$0xff] %v506_v49  ;;  %v499_v9 = vsub.f32 %v919_v42, %v469_v6  ;;  %711 = vlog2.f32 %v453_v8 }
 0x286   :  { %515 = vst [vmem:[%s1074_s4 + $0x8] sm:$0xff] %v499_v9 }
 0x289   :  { %v710_v36 = vpop.eup %709 }
 0x28a   :  { %v712_v13 = vpop.eup %711  ;;  %v471_v11 = vmul.f32 0.6931472, %v710_v36  ;;  %v455_v14 = vpop.xlane.xlu2 %454 }
 0x28b   :  { %v485_v39 = vmul.f32 0.6931472, %v712_v13  ;;  %713 = vlog2.f32 %v455_v14 }
 0x28c   :  { %v500_v15 = vsub.f32 %v925_v50, %v471_v11 }
 0x28d   :  { %v507_v18 = vsub.f32 %v928_v51, %v485_v39 }
 0x28e   :  { %516 = vst [vmem:[%s1074_s4 + $0x10] sm:$0xff] %v500_v15 }
 0x28f   :  { %523 = vst [vmem:[%s1074_s4 + $0x48] sm:$0xff] %v507_v18 }
 0x290   :  { %v457_v42 = vpop.xlane.xlu0 %456 }
 0x291   :  { %v714_v19 = vpop.eup %713  ;;  %715 = vlog2.f32 %v457_v42 }
 0x292   :  { %v487_v16 = vmul.f32 0.6931472, %v714_v19  ;;  %v441_v20 = vpop.xlane.xlu1 %440 }
 0x293   :  { %717 = vlog2.f32 %v441_v20 }
 0x294   :  { %v508_v21 = vsub.f32 %v937_v58, %v487_v16 }
 0x296   :  { %524 = vst [vmem:[%s1074_s4 + $0x50] sm:$0xff] %v508_v21 }
 0x297   :  { %v716_v50 = vpop.eup %715 }
 0x298   :  { %v489_v51 = vmul.f32 0.6931472, %v716_v50  ;;  %v443_v24 = vpop.xlane.xlu2 %442 }
 0x299   :  { %v718_v26 = vpop.eup %717  ;;  %719 = vlog2.f32 %v443_v24 }
 0x29a   :  { %v509_v27 = vsub.f32 %v945_v1, %v489_v51  ;;  %v473_v30 = vmul.f32 0.6931472, %v718_v26  ;;  %v459_v31 = vpop.xlane.xlu1 %458 }
 0x29b   :  { %721 = vlog2.f32 %v459_v31 }
 0x29c   :  { %525 = vst [vmem:[%s1074_s4 + $0x58] sm:$0xff] %v509_v27  ;;  %v501_v58 = vsub.f32 %v949_v4, %v473_v30 }
 0x29e   :  { %517 = vst [vmem:[%s1074_s4 + $0x18] sm:$0xff] %v501_v58 }
 0x29f   :  { %v720_v22 = vpop.eup %719 }
 0x2a0   :  { %v475_v35 = vmul.f32 0.6931472, %v720_v22  ;;  %v445_v23 = vpop.xlane.xlu0 %444 }
 0x2a1   :  { %v722_v37 = vpop.eup %721  ;;  %723 = vlog2.f32 %v445_v23 }
 0x2a2   :  { %v502_v1 = vsub.f32 %v955_v10, %v475_v35  ;;  %v491_v40 = vmul.f32 0.6931472, %v722_v37  ;;  %v447_v41 = vpop.xlane.xlu1 %446 }
 0x2a3   :  { %725 = vlog2.f32 %v447_v41 }
 0x2a4   :  { %518 = vst [vmem:[%s1074_s4 + $0x20] sm:$0xff] %v502_v1  ;;  %v510_v4 = vsub.f32 %v958_v12, %v491_v40 }
 0x2a6   :  { %526 = vst [vmem:[%s1074_s4 + $0x60] sm:$0xff] %v510_v4 }
 0x2a7   :  { %v724_v43 = vpop.eup %723 }
 0x2a8   :  { %v477_v44 = vmul.f32 0.6931472, %v724_v43  ;;  %v463_v28 = vpop.xlane.xlu0 %462 }
 0x2a9   :  { %v726_v46 = vpop.eup %725  ;;  %727 = vlog2.f32 %v463_v28 }
 0x2aa   :  { %v503_v10 = vsub.f32 %v967_v17, %v477_v44  ;;  %v479_v29 = vmul.f32 0.6931472, %v726_v46  ;;  %v449_v47 = vpop.xlane.xlu2 %448 }
 0x2ab   :  { %729 = vlog2.f32 %v449_v47 }
 0x2ac   :  { %519 = vst [vmem:[%s1074_s4 + $0x28] sm:$0xff] %v503_v10  ;;  %v504_v12 = vsub.f32 %v971_v25, %v479_v29 }
 0x2ae   :  { %520 = vst [vmem:[%s1074_s4 + $0x30] sm:$0xff] %v504_v12 }
 0x2af   :  { %v728_v52 = vpop.eup %727 }
 0x2b0   :  { %v495_v53 = vmul.f32 0.6931472, %v728_v52  ;;  %v465_v54 = vpop.xlane.xlu1 %464 }
 0x2b1   :  { %v730_v55 = vpop.eup %729  ;;  %731 = vlog2.f32 %v465_v54 }
 0x2b2   :  { %v512_v17 = vsub.f32 %v979_v32, %v495_v53  ;;  %v481_v33 = vmul.f32 0.6931472, %v730_v55  ;;  %v461_v56 = vpop.xlane.xlu2 %460 }
 0x2b3   :  { %733 = vlog2.f32 %v461_v56 }
 0x2b4   :  { %528 = vst [vmem:[%s1074_s4 + $0x70] sm:$0xff] %v512_v17  ;;  %v505_v25 = vsub.f32 %v983_v38, %v481_v33 }
 0x2b6   :  { %521 = vst [vmem:[%s1074_s4 + $0x38] sm:$0xff] %v505_v25 }
 0x2b7   :  { %v732_v57 = vpop.eup %731 }
 0x2b8   :  { %v497_v34 = vmul.f32 0.6931472, %v732_v57 }
 0x2b9   :  { %v734_v59 = vpop.eup %733 }
 0x2ba   :  { %v513_v60 = vsub.f32 %v991_v45, %v497_v34  ;;  %v493_v61 = vmul.f32 0.6931472, %v734_v59 }
 0x2bc   :  { %529 = vst [vmem:[%s1074_s4 + $0x78] sm:$0xff] %v513_v60  ;;  %v511_v32 = vsub.f32 %v995_v48, %v493_v61 }
 0x2be   :  { %527 = vst [vmem:[%s1074_s4 + $0x68] sm:$0xff] %v511_v32 }

// kernel: gcn_model_forward.2
= control target key start
LH: loop header
LB: loop body
LE: loop exit
PB: predicated region body
PF: predicated region fallthrough
CT: control target
= control target key end

     0   :  { %s679_s2 = inlined_call_operand.vmem [shape: bf16[128,128], index: 2, kind: input, shape index: {}]   ;;  %s680_s1 = inlined_call_operand.vmem [shape: bf16[128,128], index: 1, kind: input, shape index: {}]   ;;  %s681_s3 = inlined_call_operand.vmem [shape: f32[1,128], index: 3, kind: input, shape index: {}]   ;;  %s682_s0 = inlined_call_operand.vmem [shape: bf16[128,128], index: 0, kind: input, shape index: {}]   ;;  %s683_s4 = inlined_call_operand.vmem [shape: bf16[128,128], index: 4, kind: output, shape index: {}]  }
   0x1   :  { %v482_v0 = vld [vmem:[%s679_s2 + $0x38] sm:$0xff]  ;;  %v481_v1 = vld [vmem:[%s679_s2 + $0x30] sm:$0xff]  ;;  %v480_v2 = vld [vmem:[%s679_s2 + $0x28] sm:$0xff] }
   0x2   :  { %538 = vmatpush.bf16.msra.mxu2 %v482_v0  ;;  %145 = vmatpush.bf16.msra.mxu0 %v482_v0  ;;  %v479_v3 = vld [vmem:[%s679_s2 + $0x20] sm:$0xff]  ;;  %v478_v4 = vld [vmem:[%s679_s2 + $0x18] sm:$0xff]  ;;  %v477_v5 = vld [vmem:[%s679_s2 + $0x10] sm:$0xff] }
   0x3   :  { %v476_v6 = vld [vmem:[%s679_s2 + $0x8] sm:$0xff]  ;;  %v475_v7 = vld [vmem:[%s679_s2] sm:$0xff]  ;;  %v473_v12 = vld [vmem:[%s680_s1 + $0x30] sm:$0xff] }
   0x4   :  { %v471_v8 = vld [vmem:[%s680_s1 + $0x20] sm:$0xff]  ;;  %v472_v10 = vld [vmem:[%s680_s1 + $0x28] sm:$0xff]  ;;  %v469_v13 = vld [vmem:[%s680_s1 + $0x10] sm:$0xff] }
   0x5   :  { %v467_v9 = vld [vmem:[%s680_s1] sm:$0xff]  ;;  %v468_v11 = vld [vmem:[%s680_s1 + $0x8] sm:$0xff]  ;;  %v474_v14 = vld [vmem:[%s680_s1 + $0x38] sm:$0xff] }
   0x6   :  { %539 = vmatpush.bf16.msra.mxu2 %v481_v1  ;;  %146 = vmatpush.bf16.msra.mxu0 %v481_v1  ;;  %v470_v15 = vld [vmem:[%s680_s1 + $0x18] sm:$0xff]  ;;  %v483_v40 = vld [vmem:[%s682_s0] sm:$0xff]  ;;  %v484_v42 = vld [vmem:[%s682_s0 + $0x8] sm:$0xff] }
   0x7   :  { %v487_v41 = vld [vmem:[%s682_s0 + $0x20] sm:$0xff]  ;;  %v488_v43 = vld [vmem:[%s682_s0 + $0x28] sm:$0xff]  ;;  %v485_v44 = vld [vmem:[%s682_s0 + $0x10] sm:$0xff] }
   0x8   :  { %v489_v45 = vld [vmem:[%s682_s0 + $0x30] sm:$0xff]  ;;  %v486_v46 = vld [vmem:[%s682_s0 + $0x18] sm:$0xff]  ;;  %v554_v49 = vld [vmem:[%s681_s3] ss:$0 sm:$0xff] }
   0x9   :  { %v490_v47 = vld [vmem:[%s682_s0 + $0x38] sm:$0xff] }
   0xa   :  { %540 = vmatpush.bf16.msra.mxu2 %v480_v2  ;;  %147 = vmatpush.bf16.msra.mxu0 %v480_v2 }
   0xe   :  { %541 = vmatpush.bf16.msra.mxu2 %v479_v3  ;;  %148 = vmatpush.bf16.msra.mxu0 %v479_v3 }
  0x12   :  { %542 = vmatpush.bf16.msra.mxu2 %v478_v4  ;;  %149 = vmatpush.bf16.msra.mxu0 %v478_v4 }
  0x16   :  { %543 = vmatpush.bf16.msra.mxu2 %v477_v5  ;;  %150 = vmatpush.bf16.msra.mxu0 %v477_v5 }
  0x1a   :  { %544 = vmatpush.bf16.msra.mxu2 %v476_v6  ;;  %151 = vmatpush.bf16.msra.mxu0 %v476_v6 }
  0x1e   :  { %545 = vmatpush.bf16.msra.mxu2 %v475_v7  ;;  %152 = vmatpush.bf16.msra.mxu0 %v475_v7 }
  0x21   :  { %173 = vmatmul.bf16.vlgmr.msra.gmra.mxu2 %v471_v8  ;;  %153 = vmatmul.bf16.vlgmr.msra.gmra.mxu0 %v467_v9 }
  0x31   :  { %178 = vmatmul.bf16.gmra.mxu2 %v472_v10  ;;  %158 = vmatmul.bf16.gmra.mxu0 %v468_v11 }
  0x41   :  { %183 = vmatmul.bf16.gmra.mxu2 %v473_v12  ;;  %163 = vmatmul.bf16.gmra.mxu0 %v469_v13 }
  0x51   :  { %188 = vmatmul.bf16.gmra.mxu2 %v474_v14  ;;  %168 = vmatmul.bf16.gmra.mxu0 %v470_v15 }
  0x9e   :  { %v154_v17 = vpop.f32.mrf.mxu0 }
  0xa4   :  { %v174_v16 = vpop.f32.mrf.mxu2 }
  0xa6   :  { %v156_v19 = vpop.f32.mrf.mxu0 }
  0xa7   :  { %v210_v39 = vpack.c.bf16 %v156_v19, %v154_v17 }
  0xac   :  { %v176_v18 = vpop.f32.mrf.mxu2 }
  0xad   :  { %v214_v34 = vpack.c.bf16 %v176_v18, %v174_v16 }
  0xae   :  { %v159_v21 = vpop.f32.mrf.mxu0 }
  0xb4   :  { %v179_v20 = vpop.f32.mrf.mxu2 }
  0xb6   :  { %v161_v23 = vpop.f32.mrf.mxu0 }
  0xb7   :  { %v211_v38 = vpack.c.bf16 %v161_v23, %v159_v21 }
  0xbc   :  { %v181_v22 = vpop.f32.mrf.mxu2 }
  0xbd   :  { %v215_v33 = vpack.c.bf16 %v181_v22, %v179_v20 }
  0xbe   :  { %v164_v25 = vpop.f32.mrf.mxu0 }
  0xc4   :  { %v184_v24 = vpop.f32.mrf.mxu2 }
  0xc6   :  { %v166_v28 = vpop.f32.mrf.mxu0 }
  0xc7   :  { %v212_v37 = vpack.c.bf16 %v166_v28, %v164_v25 }
  0xcc   :  { %v186_v26 = vpop.f32.mrf.mxu2 }
  0xcd   :  { %v216_v32 = vpack.c.bf16 %v186_v26, %v184_v24 }
  0xce   :  { %v169_v31 = vpop.f32.mrf.mxu0 }
  0xd4   :  { %v189_v27 = vpop.f32.mrf.mxu2 }
  0xd6   :  { %v171_v35 = vpop.f32.mrf.mxu0 }
  0xd7   :  { %v213_v36 = vpack.c.bf16 %v171_v35, %v169_v31 }
  0xdc   :  { %v191_v29 = vpop.f32.mrf.mxu2 }
  0xdd   :  { %v217_v30 = vpack.c.bf16 %v191_v29, %v189_v27 }
  0xdf   :  { %270 = vmatpush.bf16.msra.mxu1 %v217_v30  ;;  %546 = vmatpush.bf16.msra.mxu3 %v217_v30 }
  0xe3   :  { %271 = vmatpush.bf16.msra.mxu1 %v216_v32  ;;  %547 = vmatpush.bf16.msra.mxu3 %v216_v32 }
  0xe7   :  { %272 = vmatpush.bf16.msra.mxu1 %v215_v33  ;;  %548 = vmatpush.bf16.msra.mxu3 %v215_v33 }
  0xeb   :  { %273 = vmatpush.bf16.msra.mxu1 %v214_v34  ;;  %549 = vmatpush.bf16.msra.mxu3 %v214_v34 }
  0xef   :  { %274 = vmatpush.bf16.msra.mxu1 %v213_v36  ;;  %550 = vmatpush.bf16.msra.mxu3 %v213_v36 }
  0xf3   :  { %275 = vmatpush.bf16.msra.mxu1 %v212_v37  ;;  %551 = vmatpush.bf16.msra.mxu3 %v212_v37 }
  0xf7   :  { %276 = vmatpush.bf16.msra.mxu1 %v211_v38  ;;  %552 = vmatpush.bf16.msra.mxu3 %v211_v38 }
  0xfb   :  { %277 = vmatpush.bf16.msra.mxu1 %v210_v39  ;;  %553 = vmatpush.bf16.msra.mxu3 %v210_v39 }
  0xfe   :  { %278 = vmatmul.bf16.vlgmr.msra.gmra.mxu1 %v483_v40  ;;  %298 = vmatmul.bf16.vlgmr.msra.gmra.mxu3 %v487_v41 }
 0x10e   :  { %283 = vmatmul.bf16.gmra.mxu1 %v484_v42  ;;  %303 = vmatmul.bf16.gmra.mxu3 %v488_v43 }
 0x11e   :  { %288 = vmatmul.bf16.gmra.mxu1 %v485_v44  ;;  %308 = vmatmul.bf16.gmra.mxu3 %v489_v45 }
 0x12e   :  { %293 = vmatmul.bf16.gmra.mxu1 %v486_v46  ;;  %313 = vmatmul.bf16.gmra.mxu3 %v490_v47 }
 0x17b   :  { %v279_v48 = vpop.f32.mrf.mxu1 }
 0x17c   :  { %v280_v51 = vadd.f32 %v554_v49, %v279_v48 }
 0x17e   :  { %v319_v54 = vmax.f32 %v280_v51, 0.0 }
 0x181   :  { %v299_v50 = vpop.f32.mrf.mxu3 }
 0x182   :  { %v300_v56 = vadd.f32 %v554_v49, %v299_v50 }
 0x183   :  { %v281_v52 = vpop.f32.mrf.mxu1 }
 0x184   :  { %v282_v53 = vadd.f32 %v554_v49, %v281_v52  ;;  %v327_v61 = vmax.f32 %v300_v56, 0.0 }
 0x186   :  { %v320_v55 = vmax.f32 %v282_v53, 0.0 }
 0x188   :  { %v494_v57 = vpack.c.bf16 %v320_v55, %v319_v54 }
 0x189   :  { %v301_v58 = vpop.f32.mrf.mxu3 }
 0x18a   :  { %495 = vst [vmem:[%s683_s4] sm:$0xff] %v494_v57   ;;  %v302_v59 = vadd.f32 %v554_v49, %v301_v58 }
 0x18b   :  { %v284_v60 = vpop.f32.mrf.mxu1 }
 0x18c   :  { %v328_v62 = vmax.f32 %v302_v59, 0.0  ;;  %v285_v1 = vadd.f32 %v554_v49, %v284_v60 }
 0x18e   :  { %v514_v63 = vpack.c.bf16 %v328_v62, %v327_v61  ;;  %v321_v4 = vmax.f32 %v285_v1, 0.0 }
 0x190   :  { %534 = vst [vmem:[%s683_s4 + $0x20] sm:$0xff] %v514_v63  }
 0x191   :  { %v304_v0 = vpop.f32.mrf.mxu3 }
 0x192   :  { %v305_v6 = vadd.f32 %v554_v49, %v304_v0 }
 0x193   :  { %v286_v2 = vpop.f32.mrf.mxu1 }
 0x194   :  { %v287_v3 = vadd.f32 %v554_v49, %v286_v2  ;;  %v329_v11 = vmax.f32 %v305_v6, 0.0 }
 0x196   :  { %v322_v5 = vmax.f32 %v287_v3, 0.0 }
 0x198   :  { %v499_v7 = vpack.c.bf16 %v322_v5, %v321_v4 }
 0x199   :  { %v306_v8 = vpop.f32.mrf.mxu3 }
 0x19a   :  { %531 = vst [vmem:[%s683_s4 + $0x8] sm:$0xff] %v499_v7   ;;  %v307_v9 = vadd.f32 %v554_v49, %v306_v8 }
 0x19b   :  { %v289_v10 = vpop.f32.mrf.mxu1 }
 0x19c   :  { %v330_v12 = vmax.f32 %v307_v9, 0.0  ;;  %v290_v15 = vadd.f32 %v554_v49, %v289_v10 }
 0x19e   :  { %v519_v13 = vpack.c.bf16 %v330_v12, %v329_v11  ;;  %v323_v18 = vmax.f32 %v290_v15, 0.0 }
 0x1a0   :  { %535 = vst [vmem:[%s683_s4 + $0x28] sm:$0xff] %v519_v13  }
 0x1a1   :  { %v309_v14 = vpop.f32.mrf.mxu3 }
 0x1a2   :  { %v310_v20 = vadd.f32 %v554_v49, %v309_v14 }
 0x1a3   :  { %v291_v16 = vpop.f32.mrf.mxu1 }
 0x1a4   :  { %v292_v17 = vadd.f32 %v554_v49, %v291_v16  ;;  %v331_v25 = vmax.f32 %v310_v20, 0.0 }
 0x1a6   :  { %v324_v19 = vmax.f32 %v292_v17, 0.0 }
 0x1a8   :  { %v504_v21 = vpack.c.bf16 %v324_v19, %v323_v18 }
 0x1a9   :  { %v311_v22 = vpop.f32.mrf.mxu3 }
 0x1aa   :  { %532 = vst [vmem:[%s683_s4 + $0x10] sm:$0xff] %v504_v21   ;;  %v312_v23 = vadd.f32 %v554_v49, %v311_v22 }
 0x1ab   :  { %v294_v24 = vpop.f32.mrf.mxu1 }
 0x1ac   :  { %v332_v26 = vmax.f32 %v312_v23, 0.0  ;;  %v295_v29 = vadd.f32 %v554_v49, %v294_v24 }
 0x1ae   :  { %v524_v27 = vpack.c.bf16 %v332_v26, %v331_v25  ;;  %v325_v32 = vmax.f32 %v295_v29, 0.0 }
 0x1b0   :  { %536 = vst [vmem:[%s683_s4 + $0x30] sm:$0xff] %v524_v27  }
 0x1b1   :  { %v314_v28 = vpop.f32.mrf.mxu3 }
 0x1b2   :  { %v315_v34 = vadd.f32 %v554_v49, %v314_v28 }
 0x1b3   :  { %v296_v30 = vpop.f32.mrf.mxu1 }
 0x1b4   :  { %v297_v31 = vadd.f32 %v554_v49, %v296_v30  ;;  %v333_v38 = vmax.f32 %v315_v34, 0.0 }
 0x1b6   :  { %v326_v33 = vmax.f32 %v297_v31, 0.0 }
 0x1b8   :  { %v509_v35 = vpack.c.bf16 %v326_v33, %v325_v32 }
 0x1b9   :  { %v316_v36 = vpop.f32.mrf.mxu3 }
 0x1ba   :  { %533 = vst [vmem:[%s683_s4 + $0x18] sm:$0xff] %v509_v35   ;;  %v317_v37 = vadd.f32 %v554_v49, %v316_v36 }
 0x1bc   :  { %v334_v39 = vmax.f32 %v317_v37, 0.0 }
 0x1be   :  { %v529_v40 = vpack.c.bf16 %v334_v39, %v333_v38 }
 0x1c0   :  { %537 = vst [vmem:[%s683_s4 + $0x38] sm:$0xff] %v529_v40  }

</bundles_post_ra>
